<compile_context>
chip_gen: v5e
topology: v5e:2x2
jax: 0.10.0
libtpu: 0.0.40
codegen_flags: <defaults>
</compile_context>

<pallas_src>
import functools

import jax
import jax.numpy as jnp
from jax import lax
from jax.experimental import pallas as pl
from jax.experimental.pallas import tpu as pltpu


def _round_up(v, m):
    return -(-v // m) * m


def _vmem_limits():
    """Generation-aware VMEM scoped limit and working-set budget (bytes)."""
    cap = 64 * 1024 * 1024                    # conservative fallback (v7x-sized)
    try:
        info = pltpu.get_tpu_info()
        cap = int(getattr(info, "vmem_capacity_bytes", cap))
    except Exception:
        pass
    limit = min(cap * 3 // 4, 100 * 1024 * 1024)   # ~96 MiB on 128-MiB chips, ~48 MiB on v7x
    budget = cap // 2                               # ~64 MiB / ~32 MiB
    return limit, budget


def _pick_group_tile(ns_pad, c_in_vmem, c_out_pads, slab_w, weight_bytes, budget_bytes):
    """Largest group tile (multiple of 8) whose per-step working set fits the VMEM budget."""
    dims = [c_in_vmem] + list(c_out_pads)
    n = len(c_out_pads)
    peak = 0                                   # peak live activation bytes per (group*sample) row
    for l in range(n):
        cin = dims[l]
        if l < n - 1:
            cout = dims[l + 1]
            peak = max(peak, 2 * cin + 4 * cout + 2 * cout)   # bf16 in + f32 acc + bf16 out
        else:
            peak = max(peak, 2 * cin + 4 * slab_w)            # bf16 in + f32 slab accumulator
    for gt in (2048, 1024, 512, 256, 128, 64, 32, 16, 8):
        m = gt * ns_pad
        total = (2 * m * c_in_vmem * 2          # double-buffered bf16 input tile (lane-padded)
                 + m * peak                     # peak live activations
                 + 2 * gt * c_out_pads[-1] * 4  # double-buffered f32 output tile
                 + 2 * weight_bytes)            # resident weights/biases (worst-case 2 buffers)
        if total <= budget_bytes:
            return gt
    return 8


# ----------------------------- Pallas kernel ----------------------------------------
def _sa_mlp_kernel(*refs, n_layers, ns, slab_w):
    x_ref = refs[0]            # [gt*ns, C_in_pad]  bf16  (pre-flattened, no in-kernel reshape)
    o_ref = refs[-1]           # [gt, C_out_pad]    f32
    wb = refs[1:-1]

    m, _ = x_ref.shape
    g = m // ns

    h = x_ref[...]             # bf16

    # Hidden layers: matmul (MXU, f32 accumulate) + bias + ReLU, bf16 between layers.
    for l in range(n_layers - 1):
        w = wb[2 * l][...]                                     # bf16 [Cin_l, Cout_l]
        b = wb[2 * l + 1][...]                                 # f32  [1, Cout_l]
        acc = jnp.dot(h, w, preferred_element_type=jnp.float32)
        h = jnp.maximum(acc + b, 0.0).astype(jnp.bfloat16)

    # Last layer, slabbed over output channels: max over nsample FIRST, then bias + ReLU on the
    # pooled [g, slab] tile (exact: bias-add and ReLU are monotone, so they commute with max).
    w_ref = wb[2 * (n_layers - 1)]
    b_ref = wb[2 * (n_layers - 1) + 1]
    c_out = w_ref.shape[1]
    n_slabs = c_out // slab_w
    for s in range(n_slabs):
        lo, hi = s * slab_w, (s + 1) * slab_w
        w_s = w_ref[:, lo:hi]                                            # bf16 [Cin, slab]
        acc = jnp.dot(h, w_s, preferred_element_type=jnp.float32)        # f32  [m, slab]
        pooled = jnp.max(acc.reshape(g, ns, slab_w), axis=1)             # f32  [g, slab]
        b_s = b_ref[:, lo:hi]                                            # f32  [1, slab]
        o_ref[:, lo:hi] = jnp.maximum(pooled + b_s, 0.0).astype(o_ref.dtype)


def sa_mlp(x, ws, bs, *, group_tile, ns_pad, slab_w, vmem_limit):
    """x: [G_pad*ns_pad, C_in_pad] bf16; ws/bs: padded per-layer weights (bf16) / biases (f32).
    Returns [G_pad, C_out_last_pad] f32 (max over samples, bias+ReLU applied)."""
    m_total, c_in = x.shape
    g_pad = m_total // ns_pad
    n_layers = len(ws)
    c_out = ws[-1].shape[1]
    grid = (g_pad // group_tile,)

    in_specs = [pl.BlockSpec((group_tile * ns_pad, c_in), lambda i: (i, 0))]
    operands = [x]
    for w, b in zip(ws, bs):
        # Grid-invariant index maps: weight/bias blocks stay resident (no per-step re-DMA).
        in_specs.append(pl.BlockSpec(w.shape, lambda i: (0, 0)))
        in_specs.append(pl.BlockSpec(b.shape, lambda i: (0, 0)))
        operands += [w, b]

    kernel = functools.partial(_sa_mlp_kernel, n_layers=n_layers, ns=ns_pad, slab_w=slab_w)
    return pl.pallas_call(
        kernel,
        out_shape=jax.ShapeDtypeStruct((g_pad, c_out), jnp.float32),
        grid=grid,
        in_specs=in_specs,
        out_specs=pl.BlockSpec((group_tile, c_out), lambda i: (i, 0)),
        compiler_params=pltpu.CompilerParams(
            dimension_semantics=("parallel",),        # shard group tiles across TCs on v7x
            vmem_limit_bytes=vmem_limit),
    )(*operands)


# ----------------------------- grouping glue (plain JAX) ----------------------------
def square_distance(src, dst):
    # src [B,N,C], dst [B,M,C] -> [B,N,M]
    dist = -2.0 * jnp.matmul(src, jnp.transpose(dst, (0, 2, 1)))
    dist = dist + jnp.sum(src ** 2, -1)[:, :, None]
    dist = dist + jnp.sum(dst ** 2, -1)[:, None, :]
    return dist


def index_points(points, idx):
    # points [B,N,C], idx [B,...] -> [B,...,C]
    B = points.shape[0]
    batch = jnp.arange(B).reshape((B,) + (1,) * (idx.ndim - 1))
    return points[batch, idx]


def farthest_point_sample(xyz, npoint):
    # TODO(synk): reference uses torch.randint for the start index; fixed to 0 for determinism.
    B, N, _ = xyz.shape
    batch_idx = jnp.arange(B)

    def body(i, carry):
        centroids, distance, farthest = carry
        centroids = centroids.at[:, i].set(farthest)
        centroid = xyz[batch_idx, farthest, :][:, None, :]               # [B,1,3]
        dist = jnp.sum((xyz - centroid) ** 2, -1)
        distance = jnp.minimum(distance, dist)
        farthest = jnp.argmax(distance, axis=-1).astype(jnp.int32)
        return centroids, distance, farthest

    init = (jnp.zeros((B, npoint), jnp.int32),
            jnp.full((B, N), 1e10, dtype=xyz.dtype),
            jnp.zeros((B,), jnp.int32))
    centroids, _, _ = lax.fori_loop(0, npoint, body, init)
    return centroids                                                     # [B, npoint]


def query_ball_point(radius, nsample, xyz, new_xyz):
    # Lowest-index nsample in-radius points (matches the reference's sort()[:, :, :nsample]),
    # selected with top_k instead of a full [B,S,N] sort.
    B, N, _ = xyz.shape
    S = new_xyz.shape[1]
    sqrdists = square_distance(new_xyz, xyz)                             # [B,S,N]
    idx = jnp.broadcast_to(jnp.arange(N, dtype=jnp.int32), (B, S, N))
    masked = jnp.where(sqrdists > radius ** 2, N, idx)
    neg_topk, _ = lax.top_k(-masked, nsample)                            # k smallest indices
    group_idx = -neg_topk                                                # ascending order
    group_first = jnp.broadcast_to(group_idx[:, :, :1], group_idx.shape)
    group_idx = jnp.where(group_idx == N, group_first, group_idx)
    return group_idx


def sample_and_group(npoint, radius, nsample, xyz, points):
    B, N, C = xyz.shape
    fps_idx = farthest_point_sample(xyz, npoint)
    new_xyz = index_points(xyz, fps_idx)                                 # [B,S,3]
    idx = query_ball_point(radius, nsample, xyz, new_xyz)                # [B,S,ns]
    grouped_xyz = index_points(xyz, idx)                                 # [B,S,ns,3]
    grouped_xyz_norm = grouped_xyz - new_xyz[:, :, None, :]
    if points is not None:
        grouped_points = index_points(points, idx)
        new_points = jnp.concatenate([grouped_xyz_norm, grouped_points], axis=-1)
    else:
        new_points = grouped_xyz_norm
    return new_xyz, new_points


def sample_and_group_all(xyz, points):
    B, N, C = xyz.shape
    new_xyz = jnp.zeros((B, 1, C), dtype=xyz.dtype)
    grouped_xyz = xyz.reshape(B, 1, N, C)
    if points is not None:
        new_points = jnp.concatenate([grouped_xyz, points.reshape(B, 1, N, -1)], axis=-1)
    else:
        new_points = grouped_xyz
    return new_xyz, new_points


# ----------------------------- module ------------------------------------------------
class PointNetSetAbstraction:
    def __init__(self, npoint, radius, nsample, in_channel, mlp, group_all, key):
        self.npoint = npoint
        self.radius = radius
        self.nsample = nsample
        self.group_all = group_all
        self.layers = []
        last = in_channel
        for out_channel in mlp:
            key, k1, k2, k3, k4, k5, k6 = jax.random.split(key, 7)
            self.layers.append(dict(
                conv_w=0.2 * jax.random.normal(k1, (out_channel, last), jnp.float32),
                conv_b=0.1 * jax.random.normal(k2, (out_channel,), jnp.float32),
                gamma=1.0 + 0.1 * jax.random.normal(k3, (out_channel,), jnp.float32),
                beta=0.1 * jax.random.normal(k4, (out_channel,), jnp.float32),
                r_mean=0.05 * jax.random.normal(k5, (out_channel,), jnp.float32),
                r_var=0.5 + jax.random.uniform(k6, (out_channel,), jnp.float32),
            ))
            last = out_channel

    def __call__(self, xyz, points):
        # xyz: [B, 3, N], points: [B, D, N] or None
        xyz_t = jnp.transpose(xyz, (0, 2, 1))
        points_t = jnp.transpose(points, (0, 2, 1)) if points is not None else None

        if self.group_all:
            new_xyz, new_points = sample_and_group_all(xyz_t, points_t)
        else:
            new_xyz, new_points = sample_and_group(
                self.npoint, self.radius, self.nsample, xyz_t, points_t)

        B, S, ns, C = new_points.shape
        n_groups = B * S

        # Fold BatchNorm (eval mode, running stats) into the 1x1-conv weight/bias.
        # TODO(synk): training-mode BN (batch statistics) is not reproduced; eval-mode stats used.
        ws_f32, bs_f32 = [], []
        for p in self.layers:
            scale = p['gamma'] / jnp.sqrt(p['r_var'] + 1e-5)
            ws_f32.append((p['conv_w'] * scale[:, None]).T)                      # [in, out]
            bs_f32.append(((p['conv_b'] - p['r_mean']) * scale + p['beta']).reshape(1, -1))

        # Channel padding: input only to a multiple of 16 (bf16 sublane), hidden/output to 128
        # (lane-dense matmuls + stores).
        c_in_pad = _round_up(C, 16)
        c_outs = [w.shape[1] for w in ws_f32]
        c_out_pads = [_round_up(c, 128) for c in c_outs]
        ns_pad = _round_up(ns, 16)

        ws_pad, bs_pad = [], []
        prev_pad = c_in_pad
        weight_bytes = 0
        for w, b, cop in zip(ws_f32, bs_f32, c_out_pads):
            cin_l, cout_l = w.shape
            wp = jnp.zeros((prev_pad, cop), jnp.float32).at[:cin_l, :cout_l].set(w)
            bp = jnp.zeros((1, cop), jnp.float32).at[:, :cout_l].set(b)
            ws_pad.append(wp.astype(jnp.bfloat16))      # bf16 weights for the MXU
            bs_pad.append(bp)                           # bias stays f32
            weight_bytes += prev_pad * cop * 2 + cop * 4
            prev_pad = cop

        # Last-layer output-channel slab width (bounds the f32 live activation).
        c_last_pad = c_out_pads[-1]
        if c_last_pad <= 256:
            slab_w = c_last_pad
        elif c_last_pad % 256 == 0:
            slab_w = 256
        else:
            slab_w = 128

        # Generation-aware VMEM budget -> group tile.
        vmem_limit, vmem_budget = _vmem_limits()
        c_in_vmem = max(c_in_pad, 128)                  # VMEM lane padding of the narrow input
        gt = _pick_group_tile(ns_pad, c_in_vmem, c_out_pads, slab_w, weight_bytes, vmem_budget)
        gt = min(gt, _round_up(n_groups, 8))
        # Prefer >= ~8 grid steps so v7x's two TensorCores both get work and pipelining amortizes.
        while gt > 8 and pl.cdiv(n_groups, gt) < 8:
            new_gt = max(8, (gt // 2) // 8 * 8)
            if new_gt == gt:
                break
            gt = new_gt
        steps = pl.cdiv(n_groups, gt)
        if steps > 1 and steps % 2 == 1:
            steps += 1                                  # even step count for the 2-TC split
        g_pad = steps * gt

        # Stage the grouped tensor in bf16 with the small channel pad (natural [G, ns, C] layout,
        # then flatten to 2D so the kernel needs no reshape of its input block).
        x = new_points.astype(jnp.bfloat16).reshape(n_groups, ns, C)
        if ns_pad != ns:
            # Pad samples by repeating the first sample in each group (max is unchanged).
            rep = jnp.broadcast_to(x[:, :1, :], (n_groups, ns_pad - ns, C))
            x = jnp.concatenate([x, rep], axis=1)
        if c_in_pad != C or g_pad != n_groups:
            x = jnp.pad(x, ((0, g_pad - n_groups), (0, 0), (0, c_in_pad - C)))
        x = x.reshape(g_pad * ns_pad, c_in_pad)

        feat = sa_mlp(x, ws_pad, bs_pad, group_tile=gt, ns_pad=ns_pad,
                      slab_w=slab_w, vmem_limit=vmem_limit)              # [g_pad, C_out_pad] f32
        feat = feat[:n_groups, :c_outs[-1]]                              # drop padding

        new_points_out = jnp.transpose(feat.reshape(B, S, -1), (0, 2, 1))   # [B, C_out, S]
        new_xyz_out = jnp.transpose(new_xyz, (0, 2, 1))                     # [B, 3, S]
        return new_xyz_out, new_points_out


# ----------------------------- demo ---------------------------------------------------
if __name__ == "__main__":
    key = jax.random.PRNGKey(0)
    k_xyz, k_pts, k_params = jax.random.split(key, 3)

    B, N, D = 2, 16, 4
    npoint, radius, nsample = 8, 0.6, 8
    mlp = [16, 32]

    xyz = jax.random.uniform(k_xyz, (B, 3, N), jnp.float32)      # [B, 3, N]
    points = jax.random.normal(k_pts, (B, D, N), jnp.float32)    # [B, D, N]

    sa = PointNetSetAbstraction(npoint=npoint, radius=radius, nsample=nsample,
                                in_channel=3 + D, mlp=mlp, group_all=False,
                                key=k_params)

    new_xyz, new_points = sa(xyz, points)
    jax.block_until_ready(new_xyz)
    jax.block_until_ready(new_points)

    assert new_xyz.shape == (B, 3, npoint)
    assert new_points.shape == (B, mlp[-1], npoint)
    print("KERNEL_OK")
</pallas_src>

<mosaic_0001>
module attributes {stable_mosaic.version = 11 : i64} {
  func.func @_sa_mlp_kernel(%arg0: i32, %arg1: memref<128x16xbf16, #tpu.memory_space<vmem>>, %arg2: memref<16x128xbf16, #tpu.memory_space<vmem>>, %arg3: memref<1x128xf32, #tpu.memory_space<vmem>>, %arg4: memref<128x128xbf16, #tpu.memory_space<vmem>>, %arg5: memref<1x128xf32, #tpu.memory_space<vmem>>, %arg6: memref<8x128xf32, #tpu.memory_space<vmem>>) attributes {dimension_semantics = [#tpu.dimension_semantics<parallel>], iteration_bounds = array<i64: 2>, scalar_prefetch = 0 : i64, scratch_operands = 0 : i64, tpu.core_type = #tpu.core_type<tc>, window_params = [{transform_indices = @transform_0, window_bounds = array<i64: 128, 16>}, {pipeline_mode = #tpu.pipeline_mode<synchronous>, transform_indices = @transform_1, window_bounds = array<i64: 16, 128>}, {pipeline_mode = #tpu.pipeline_mode<synchronous>, transform_indices = @transform_2, window_bounds = array<i64: 1, 128>}, {pipeline_mode = #tpu.pipeline_mode<synchronous>, transform_indices = @transform_3, window_bounds = array<i64: 128, 128>}, {pipeline_mode = #tpu.pipeline_mode<synchronous>, transform_indices = @transform_4, window_bounds = array<i64: 1, 128>}, {transform_indices = @transform_5, window_bounds = array<i64: 8, 128>}]} {
    %c0 = arith.constant 0 : index
    %c0_0 = arith.constant 0 : index
    %0 = vector.load %arg1[%c0, %c0_0] : memref<128x16xbf16, #tpu.memory_space<vmem>>, vector<128x16xbf16>
    %c0_1 = arith.constant 0 : index
    %c0_2 = arith.constant 0 : index
    %1 = vector.load %arg2[%c0_1, %c0_2] : memref<16x128xbf16, #tpu.memory_space<vmem>>, vector<16x128xbf16>
    %c0_3 = arith.constant 0 : index
    %c0_4 = arith.constant 0 : index
    %2 = vector.load %arg3[%c0_3, %c0_4] : memref<1x128xf32, #tpu.memory_space<vmem>>, vector<1x128xf32>
    %cst = arith.constant dense<0.000000e+00> : vector<128x128xf32>
    %3 = tpu.matmul %0, %1, %cst {dimension_numbers = #tpu.dot_dimension_numbers<[1], [0], [0], [1], [0, 0, 1, 1], [], []>} : vector<128x16xbf16>, vector<16x128xbf16>, vector<128x128xf32> -> vector<128x128xf32>
    %4 = vector.broadcast %2 : vector<1x128xf32> to vector<128x128xf32>
    %5 = arith.addf %3, %4 : vector<128x128xf32>
    %cst_5 = arith.constant 0.000000e+00 : f32
    %6 = vector.broadcast %cst_5 : f32 to vector<128x128xf32>
    %7 = arith.maximumf %5, %6 : vector<128x128xf32>
    %8 = arith.truncf %7 : vector<128x128xf32> to vector<128x128xbf16>
    %c0_6 = arith.constant 0 : index
    %c0_7 = arith.constant 0 : index
    %9 = vector.load %arg4[%c0_6, %c0_7] : memref<128x128xbf16, #tpu.memory_space<vmem>>, vector<128x128xbf16>
    %cst_8 = arith.constant dense<0.000000e+00> : vector<128x128xf32>
    %10 = tpu.matmul %8, %9, %cst_8 {dimension_numbers = #tpu.dot_dimension_numbers<[1], [0], [0], [1], [0, 0, 1, 1], [], []>} : vector<128x128xbf16>, vector<128x128xbf16>, vector<128x128xf32> -> vector<128x128xf32>
    %11 = vector.shape_cast %10 : vector<128x128xf32> to vector<8x16x128xf32>
    %cst_9 = arith.constant dense<0xFF800000> : vector<8x128xf32>
    %12 = vector.multi_reduction <maximumf>, %11, %cst_9 [1] : vector<8x16x128xf32> to vector<8x128xf32>
    %c0_10 = arith.constant 0 : index
    %c0_11 = arith.constant 0 : index
    %13 = vector.load %arg5[%c0_10, %c0_11] : memref<1x128xf32, #tpu.memory_space<vmem>>, vector<1x128xf32>
    %14 = vector.broadcast %13 : vector<1x128xf32> to vector<8x128xf32>
    %15 = arith.addf %12, %14 : vector<8x128xf32>
    %cst_12 = arith.constant 0.000000e+00 : f32
    %16 = vector.broadcast %cst_12 : f32 to vector<8x128xf32>
    %17 = arith.maximumf %15, %16 : vector<8x128xf32>
    %c0_13 = arith.constant 0 : index
    %c0_14 = arith.constant 0 : index
    %18 = vector.load %arg6[%c0_13, %c0_14] : memref<8x128xf32, #tpu.memory_space<vmem>>, vector<8x128xf32>
    tpu.vector_store %arg6[%c0_13, %c0_14], %17 {strides = array<i32>} : memref<8x128xf32, #tpu.memory_space<vmem>>, vector<8x128xf32>,
    return
  }
  func.func @transform_0(%arg0: i32) -> (i32, i32) {
    %c0_i32 = arith.constant 0 : i32
    %c0_i32_0 = arith.constant 0 : i32
    return %arg0, %c0_i32 : i32, i32
  }
  func.func @transform_1(%arg0: i32) -> (i32, i32) {
    %c0_i32 = arith.constant 0 : i32
    %c0_i32_0 = arith.constant 0 : i32
    %c0_i32_1 = arith.constant 0 : i32
    return %c0_i32, %c0_i32_0 : i32, i32
  }
  func.func @transform_2(%arg0: i32) -> (i32, i32) {
    %c0_i32 = arith.constant 0 : i32
    %c0_i32_0 = arith.constant 0 : i32
    %c0_i32_1 = arith.constant 0 : i32
    return %c0_i32, %c0_i32_0 : i32, i32
  }
  func.func @transform_3(%arg0: i32) -> (i32, i32) {
    %c0_i32 = arith.constant 0 : i32
    %c0_i32_0 = arith.constant 0 : i32
    %c0_i32_1 = arith.constant 0 : i32
    return %c0_i32, %c0_i32_0 : i32, i32
  }
  func.func @transform_4(%arg0: i32) -> (i32, i32) {
    %c0_i32 = arith.constant 0 : i32
    %c0_i32_0 = arith.constant 0 : i32
    %c0_i32_1 = arith.constant 0 : i32
    return %c0_i32, %c0_i32_0 : i32, i32
  }
  func.func @transform_5(%arg0: i32) -> (i32, i32) {
    %c0_i32 = arith.constant 0 : i32
    %c0_i32_0 = arith.constant 0 : i32
    return %arg0, %c0_i32 : i32, i32
  }
}

</mosaic_0001>

<bundles_post_ra>
// kernel: tpu_custom_call.1
= control target key start
LH: loop header
LB: loop body
LE: loop exit
PB: predicated region body
PF: predicated region fallthrough
CT: control target
= control target key end

     0   :  { %10 = vsyncpa [#allocation3], 0  ;;  %s1067_s0 = inlined_call_operand.vmem [shape: bf16[256,16], index: 0, kind: input, shape index: {}]   ;;  %s1068_s1 = inlined_call_operand.vmem [shape: bf16[16,128], index: 1, kind: input, shape index: {}]   ;;  %s1069_s2 = inlined_call_operand.vmem [shape: f32[1,128], index: 2, kind: input, shape index: {}]   ;;  %s1070_s3 = inlined_call_operand.vmem [shape: bf16[128,128], index: 3, kind: input, shape index: {}]   ;;  %s1071_s4 = inlined_call_operand.vmem [shape: f32[1,128], index: 4, kind: input, shape index: {}]   ;;  %s1072_s5 = inlined_call_operand.hbm [shape: f32[16,128], index: 5, kind: output, shape index: {}]  }
   0x1   :  { %12 = vsyncpa [#allocation3 + $0x1], 0  ;;  %s935_s18 = smov 0   ;;  %s937_s19 = smov 0  }
   0x2   :  { %s939_s20 = smov 0   ;;  %s941_s21 = smov 0  }
   0x3 LB: > { %s956_s22 = sadd.s32 4294967295, %s903_s21   ;;  %s687_s23 = sadd.s32 4294967294, %s903_s21   ;;  %s903_s21 = sphi %s941_s21, %s1078_s21   ;;  %s899_s20 = sphi %s939_s20, %s1077_s20   ;;  %s895_s19 = sphi %s937_s19, %s1076_s19   ;;  %s891_s18 = sphi %s935_s18, %s1075_s18  }
   0x4   : > { %s960_s24 = sadd.s32 1, %s903_s21   ;;  %s135_s25 = sadd.s32 1, %s899_s20 }
   0x5   : > { %s132_s26 = ssub.s32 %s903_s21, %s960_s24  ;;  %p145_p0 = scmp.ne.s32.totalorder %s899_s20, %s895_s19 }
   0x6   : > { %p133_p1 = scmp.eq.s32.totalorder %s132_s26, 0  ;;  %p146_p2 = scmp.eq.s32.totalorder %s956_s22, 1 }
   0x7   : > { %p151_p3 = scmp.ne.s32.totalorder %s895_s19, %s891_s18  ;;  %p152_p4 = scmp.eq.s32.totalorder %s687_s23, 1 }
   0x8   : > { %s971_s27 = scalar_select %p133_p1, %s899_s20, %s135_s25  }
   0x9   : > { %p973_p5 = por %p146_p2, %p145_p0  ;;  %p977_p6 = por %p152_p4, %p151_p3 }
   0xa   : > { %p690_p7 = scmp.ge.s32.totalorder %s903_s21, 1  ;;  %p191_p8 = scmp.lt.s32.totalorder %s903_s21, 3 }
   0xc   : > { %p192_p9 = pnand %p690_p7, %p191_p8 }
   0xd   : > { %s692_s7 = sshll.u32 (!%p192_p9), %s956_s22, 4  ;;  %s216_s16 = sand.u32 (!%p192_p9), 1, %s895_s19  }
   0xe   : > { %195 = sbr.rel (%p192_p9) target bundleno = 439 (0x1b7), region = 40  ;;  %p220_p10 = scmp.lt.s32.totalorder (!%p192_p9), %s692_s7, 31 }
   0xf   : > { %s1031_s17 = sshll.u32 (!%p192_p9), %s216_s16, 3  ;;  %s771_s23 = sshll.u32 (!%p192_p9), %s956_s22, 3 }
  0x10   : > { %s623_s30 = scalar_lea.hbm (!%p192_p9), %s1072_s5, %s771_s23  ;;  %s218_s22 = scalar_lea.vmem (!%p192_p9), [#allocation2], %s1031_s17 }
  0x11   : > { %s625_s6 = sshll.u32 (!%p192_p9), %s218_s22, 4  ;;  %s861_s13 = scalar_lea.hbm (!%p192_p9), %s1072_s5, 16  ;;  %s626_s6 = int_to_ptr.vmem [resolvable:$true] %s625_s6 }
  0x13   : > { %v782_v0 = vld [vmem:[%s1068_s1] sm:$0xff]  ;;  %s1080_s7 = smov (!%p220_p10, %s692_s7), 31  ;;  %vm294_vm0 = vcmask 130048   ;;  %v790_v5 = vld [vmem:[%s1070_s3 + $0x38] sm:$0xff]  ;;  %v789_v6 = vld [vmem:[%s1070_s3 + $0x30] sm:$0xff]  ;;  %vm590_vm1 = vcmask 1041409  }
  0x14   : > { %326 = vmatpush.bf16.msra.mxu0 %v782_v0  ;;  %791 = vmatpush.bf16.msra.mxu3 %v782_v0  ;;  %s693_s8 = sshll.u32 %s1080_s7, 2  ;;  %v788_v7 = vld [vmem:[%s1070_s3 + $0x28] sm:$0xff]  ;;  %v787_v9 = vld [vmem:[%s1070_s3 + $0x20] sm:$0xff]  ;;  %v786_v13 = vld [vmem:[%s1070_s3 + $0x18] sm:$0xff]  ;;  %vm593_vm2 = vcmask 1042434   ;;  %vm596_vm3 = vcmask 1043459  }
  0x15   : > { %s223_s11 = scalar_lea.vmem %s1067_s0, %s693_s8  ;;  %456 = vmatpush.bf16.msra.mxu1 %v790_v5  ;;  %792 = vmatpush.bf16.msra.mxu2 %v790_v5  ;;  %v785_v14 = vld [vmem:[%s1070_s3 + $0x10] sm:$0xff]  ;;  %v784_v15 = vld [vmem:[%s1070_s3 + $0x8] sm:$0xff]  ;;  %v783_v16 = vld [vmem:[%s1070_s3] sm:$0xff]  ;;  %vm599_vm4 = vcmask 1044484   ;;  %vm602_vm5 = vcmask 1045509   ;;  %vm605_vm6 = vcmask 1046534  }
  0x16   : > { %v774_v1 = vld [vmem:[%s223_s11] sm:$0xff]  ;;  %v775_v2 = vld [vmem:[%s223_s11 + $0x8] sm:$0xff]  ;;  %v776_v3 = vld [vmem:[%s223_s11 + $0x10] sm:$0xff]  ;;  %s627_s7 = sshll.u32 %s623_s30, 4  ;;  %vm608_vm7 = vcmask 1047559   ;;  %s613_s8 = scalar_lea.sflag [#allocation3], %s216_s16  ;;  %s628_s7 = int_to_ptr.hbm [resolvable:$true] %s627_s7 }
  0x17   : > { %730 = vmatmul.msk.bf16.vlgmr.msra.gmra.mxu0 %vm294_vm0, %v774_v1  ;;  %v779_v4 = vld [vmem:[%s223_s11 + $0x28] sm:$0xff]  ;;  %v777_v8 = vld [vmem:[%s223_s11 + $0x18] sm:$0xff]  ;;  %v780_v10 = vld [vmem:[%s223_s11 + $0x30] sm:$0xff]  ;;  %s855_s9 = sshra.s32 %s628_s7, 4  ;;  %s856_s9 = int_to_ptr.hbm [resolvable:$true] %s855_s9 }
  0x18   : > { %735 = vmatmul.msk.bf16.vlgmr.msra.gmra.mxu3 %vm294_vm0, %v779_v4  ;;  %v778_v11 = vld [vmem:[%s223_s11 + $0x20] sm:$0xff]  ;;  %v781_v12 = vld [vmem:[%s223_s11 + $0x38] sm:$0xff]  ;;  %s857_s10 = scalar_lea.hbm %s856_s9, 8  ;;  %p862_p0 = scmp.lt.s32.totalorder %s856_s9, %s1072_s5 }
  0x19   : > { %457 = vmatpush.bf16.msra.mxu1 %v789_v6  ;;  %793 = vmatpush.bf16.msra.mxu2 %v789_v6  ;;  %v839_v18 = vld [vmem:[%s1069_s2] ss:$0 sm:$0xff]  ;;  %p858_p11 = scmp.ne.s32.totalorder %s856_s9, %s857_s10  ;;  %p863_p1 = scmp.lt.s32.totalorder %s861_s13, %s857_s10 }
  0x1b   : > { %p859_p12 = pnand %p858_p11, %p973_p5  ;;  %p864_p2 = por %p863_p1, %p862_p0 }
  0x1d   : > { %458 = vmatpush.bf16.msra.mxu1 %v788_v7  ;;  %794 = vmatpush.bf16.msra.mxu2 %v788_v7  ;;  %p860_p13 = pneg %p859_p12 }
  0x1f   : > { %p865_p3 = pnand %p864_p2, %p860_p13 }
  0x21   : > { %459 = vmatpush.bf16.msra.mxu1 %v787_v9  ;;  %795 = vmatpush.bf16.msra.mxu2 %v787_v9 }
  0x25   : > { %460 = vmatpush.bf16.msra.mxu1 %v786_v13  ;;  %796 = vmatpush.bf16.msra.mxu2 %v786_v13 }
  0x27   : > { %731 = vmatmul.msk.bf16.gmra.mxu0 %vm294_vm0, %v775_v2 }
  0x28   : > { %736 = vmatmul.msk.bf16.gmra.mxu3 %vm294_vm0, %v780_v10 }
  0x29   : > { %461 = vmatpush.bf16.msra.mxu1 %v785_v14  ;;  %797 = vmatpush.bf16.msra.mxu2 %v785_v14 }
  0x2d   : > { %462 = vmatpush.bf16.msra.mxu1 %v784_v15  ;;  %798 = vmatpush.bf16.msra.mxu2 %v784_v15 }
  0x31   : > { %463 = vmatpush.bf16.msra.mxu1 %v783_v16  ;;  %799 = vmatpush.bf16.msra.mxu2 %v783_v16 }
  0x37   : > { %732 = vmatmul.msk.bf16.gmra.mxu0 %vm294_vm0, %v776_v3 }
  0x38   : > { %737 = vmatmul.msk.bf16.gmra.mxu3 %vm294_vm0, %v781_v12 }
  0x47   : > { %733 = vmatmul.msk.bf16.gmra.mxu0 %vm294_vm0, %v777_v8 }
  0x57   : > { %734 = vmatmul.msk.bf16.gmra.mxu0 %vm294_vm0, %v778_v11 }
  0x94   : > { %v328_v17 = vpop.f32.mrf.mxu0 }
  0x95   : > { %v329_v19 = vadd.f32 %v839_v18, %v328_v17 }
  0x97   : > { %v368_v22 = vmax.f32 %v329_v19, 0.0 }
  0x9b   : > { %v353_v47 = vpop.f32.mrf.mxu3 }
  0x9c   : > { %v330_v20 = vpop.f32.mrf.mxu0  ;;  %v354_v56 = vadd.f32 %v839_v18, %v353_v47 }
  0x9d   : > { %v331_v21 = vadd.f32 %v839_v18, %v330_v20 }
  0x9e   : > { %v378_v58 = vmax.f32 %v354_v56, 0.0 }
  0x9f   : > { %v369_v23 = vmax.f32 %v331_v21, 0.0 }
  0xa1   : > { %v384_v24 = vpack.c.bf16 %v369_v23, %v368_v22 }
  0xa3   : > { %464 = vmatmul.bf16.vlgmr.msra.gmra.mxu1 %v384_v24  ;;  %v355_v51 = vpop.f32.mrf.mxu3 }
  0xa4   : > { %v333_v25 = vpop.f32.mrf.mxu0  ;;  %v356_v57 = vadd.f32 %v839_v18, %v355_v51 }
  0xa5   : > { %v334_v26 = vadd.f32 %v839_v18, %v333_v25 }
  0xa6   : > { %v379_v59 = vmax.f32 %v356_v57, 0.0 }
  0xa7   : > { %v370_v29 = vmax.f32 %v334_v26, 0.0 }
  0xa8   : > { %v389_v60 = vpack.c.bf16 %v379_v59, %v378_v58 }
  0xab   : > { %v358_v55 = vpop.f32.mrf.mxu3 }
  0xac   : > { %v335_v27 = vpop.f32.mrf.mxu0  ;;  %v359_v62 = vadd.f32 %v839_v18, %v358_v55 }
  0xad   : > { %v336_v28 = vadd.f32 %v839_v18, %v335_v27 }
  0xae   : > { %v380_v1 = vmax.f32 %v359_v62, 0.0 }
  0xaf   : > { %v371_v30 = vmax.f32 %v336_v28, 0.0 }
  0xb1   : > { %v385_v31 = vpack.c.bf16 %v371_v30, %v370_v29 }
  0xb3   : > { %469 = vmatmul.bf16.gmra.mxu1 %v385_v31  ;;  %v360_v61 = vpop.f32.mrf.mxu3 }
  0xb4   : > { %v338_v32 = vpop.f32.mrf.mxu0  ;;  %v361_v63 = vadd.f32 %v839_v18, %v360_v61 }
  0xb5   : > { %v339_v33 = vadd.f32 %v839_v18, %v338_v32 }
  0xb6   : > { %v381_v2 = vmax.f32 %v361_v63, 0.0 }
  0xb7   : > { %v372_v36 = vmax.f32 %v339_v33, 0.0 }
  0xb8   : > { %v390_v3 = vpack.c.bf16 %v381_v2, %v380_v1 }
  0xbb   : > { %v363_v0 = vpop.f32.mrf.mxu3 }
  0xbc   : > { %v340_v34 = vpop.f32.mrf.mxu0  ;;  %v364_v5 = vadd.f32 %v839_v18, %v363_v0 }
  0xbd   : > { %v341_v35 = vadd.f32 %v839_v18, %v340_v34 }
  0xbe   : > { %v382_v7 = vmax.f32 %v364_v5, 0.0 }
  0xbf   : > { %v373_v37 = vmax.f32 %v341_v35, 0.0 }
  0xc1   : > { %v386_v38 = vpack.c.bf16 %v373_v37, %v372_v36 }
  0xc3   : > { %474 = vmatmul.bf16.gmra.mxu1 %v386_v38  ;;  %v365_v4 = vpop.f32.mrf.mxu3 }
  0xc4   : > { %v343_v39 = vpop.f32.mrf.mxu0  ;;  %v366_v6 = vadd.f32 %v839_v18, %v365_v4 }
  0xc5   : > { %v344_v40 = vadd.f32 %v839_v18, %v343_v39 }
  0xc6   : > { %v383_v8 = vmax.f32 %v366_v6, 0.0  ;;  %v840_v6 = vld [vmem:[%s1071_s4] ss:$0 sm:$0xff] }
  0xc7   : > { %v374_v43 = vmax.f32 %v344_v40, 0.0 }
  0xc8   : > { %v391_v9 = vpack.c.bf16 %v383_v8, %v382_v7 }
  0xcc   : > { %v345_v41 = vpop.f32.mrf.mxu0 }
  0xcd   : > { %v346_v42 = vadd.f32 %v839_v18, %v345_v41 }
  0xcf   : > { %v375_v44 = vmax.f32 %v346_v42, 0.0 }
  0xd1   : > { %v387_v45 = vpack.c.bf16 %v375_v44, %v374_v43 }
  0xd3   : > { %479 = vmatmul.bf16.gmra.mxu1 %v387_v45 }
  0xd4   : > { %v348_v46 = vpop.f32.mrf.mxu0 }
  0xd5   : > { %v349_v48 = vadd.f32 %v839_v18, %v348_v46 }
  0xd7   : > { %v376_v52 = vmax.f32 %v349_v48, 0.0 }
  0xdc   : > { %v350_v49 = vpop.f32.mrf.mxu0 }
  0xdd   : > { %v351_v50 = vadd.f32 %v839_v18, %v350_v49 }
  0xdf   : > { %v377_v53 = vmax.f32 %v351_v50, 0.0 }
  0xe1   : > { %v388_v54 = vpack.c.bf16 %v377_v53, %v376_v52 }
  0xe3   : > { %484 = vmatmul.bf16.vlgmr.msra.gmra.mxu2 %v388_v54 }
  0xf3   : > { %489 = vmatmul.bf16.gmra.mxu2 %v389_v60 }
 0x103   : > { %494 = vmatmul.bf16.gmra.mxu2 %v390_v3 }
 0x113   : > { %499 = vmatmul.bf16.gmra.mxu2 %v391_v9 }
 0x120   : > { %v465_v10 = vpop.f32.mrf.mxu1 }
 0x128   : > { %v467_v11 = vpop.f32.mrf.mxu1 }
 0x129   : > { %v505_v30 = vmax.f32 %v465_v10, %v467_v11 }
 0x12b   : > { %v506_v37 = vrot.slane %v505_v30, 4 }
 0x12d   : > { %v507_v45 = vmax.f32 %v505_v30, %v506_v37 }
 0x12f   : > { %v508_v54 = vrot.slane %v507_v45, 2 }
 0x130   : > { %v470_v12 = vpop.f32.mrf.mxu1 }
 0x131   : > { %v509_v61 = vmax.f32 %v507_v45, %v508_v54 }
 0x133   : > { %v510_v5 = vrot.slane %v509_v61, 1 }
 0x138   : > { %v472_v13 = vpop.f32.mrf.mxu1 }
 0x139   : > { %v512_v23 = vmax.f32 %v470_v12, %v472_v13 }
 0x13b   : > { %v513_v27 = vrot.slane %v512_v23, 4 }
 0x13d   : > { %v514_v33 = vmax.f32 %v512_v23, %v513_v27 }
 0x13f   : > { %v515_v41 = vrot.slane %v514_v33, 2 }
 0x140   : > { %v475_v14 = vpop.f32.mrf.mxu1 }
 0x141   : > { %v516_v49 = vmax.f32 %v514_v33, %v515_v41 }
 0x143   : > { %v517_v57 = vrot.slane %v516_v49, 1 }
 0x145   : > { %v518_v0 = vmax.f32 %v516_v49, %v517_v57 }
 0x147   : > { %v566_v10 = vadd.f32 %v840_v6, %v518_v0 }
 0x148   : > { %v477_v17 = vpop.f32.mrf.mxu1 }
 0x149   : > { %v519_v24 = vmax.f32 %v475_v14, %v477_v17 }
 0x14b   : > { %v520_v29 = vrot.slane %v519_v24, 4 }
 0x14d   : > { %v521_v35 = vmax.f32 %v519_v24, %v520_v29 }
 0x14f   : > { %v522_v44 = vrot.slane %v521_v35, 2 }
 0x150   : > { %v480_v20 = vpop.f32.mrf.mxu1 }
 0x151   : > { %v523_v51 = vmax.f32 %v521_v35, %v522_v44 }
 0x153   : > { %v524_v59 = vrot.slane %v523_v51, 1 }
 0x155   : > { %v525_v2 = vmax.f32 %v523_v51, %v524_v59 }
 0x157   : > { %v567_v13 = vadd.f32 %v840_v6, %v525_v2 }
 0x158   : > { %v482_v22 = vpop.f32.mrf.mxu1 }
 0x159   : > { %v526_v18 = vmax.f32 %v480_v20, %v482_v22  ;;  %v574_v20 = vmax.f32 %v566_v10, 0.0  ;;  %v575_v23 = vmax.f32 %v567_v13, 0.0 }
 0x15b   : > { %v527_v31 = vrot.slane %v526_v18, 4 }
 0x15d   : > { %v528_v38 = vmax.f32 %v526_v18, %v527_v31  ;;  %v592_v31 = vrot.slane %v575_v23, 6 }
 0x15f   : > { %v529_v46 = vrot.slane %v528_v38, 2 }
 0x161   : > { %v530_v55 = vmax.f32 %v528_v38, %v529_v46 }
 0x163   : > { %v531_v62 = vrot.slane %v530_v55, 1 }
 0x165   : > { %v532_v7 = vmax.f32 %v530_v55, %v531_v62 }
 0x166   : > { %v485_v15 = vpop.f32.mrf.mxu2 }
 0x16e   : > { %v487_v16 = vpop.f32.mrf.mxu2 }
 0x16f   : > { %v533_v26 = vmax.f32 %v485_v15, %v487_v16  ;;  %v511_v15 = vmax.f32 %v509_v61, %v510_v5  ;;  %v568_v16 = vadd.f32 %v840_v6, %v532_v7 }
 0x171   : > { %v534_v32 = vrot.slane %v533_v26, 4  ;;  %v576_v18 = vmax.f32 %v568_v16, 0.0 }
 0x173   : > { %v535_v40 = vmax.f32 %v533_v26, %v534_v32 }
 0x175   : > { %v536_v48 = vrot.slane %v535_v40, 2 }
 0x176   : > { %v490_v19 = vpop.f32.mrf.mxu2 }
 0x177   : > { %v537_v56 = vmax.f32 %v535_v40, %v536_v48 }
 0x179   : > { %v538_v63 = vrot.slane %v537_v56, 1 }
 0x17b   : > { %v539_v9 = vmax.f32 %v537_v56, %v538_v63 }
 0x17e   : > { %v492_v21 = vpop.f32.mrf.mxu2 }
 0x17f   : > { %v540_v28 = vmax.f32 %v490_v19, %v492_v21  ;;  %v569_v19 = vadd.f32 %v840_v6, %v539_v9 }
 0x181   : > { %v541_v34 = vrot.slane %v540_v28, 4  ;;  %v577_v27 = vmax.f32 %v569_v19, 0.0 }
 0x183   : > { %v542_v42 = vmax.f32 %v540_v28, %v541_v34  ;;  %v589_v28 = vrot.slane %v574_v20, 7  ;;  %v595_v34 = vrot.slane %v576_v18, 5 }
 0x185   : > { %v543_v50 = vrot.slane %v542_v42, 2 }
 0x186   : > { %v495_v25 = vpop.f32.mrf.mxu2 }
 0x187   : > { %v544_v58 = vmax.f32 %v542_v42, %v543_v50 }
 0x189   : > { %v545_v1 = vrot.slane %v544_v58, 1 }
 0x18b   : > { %v546_v11 = vmax.f32 %v544_v58, %v545_v1 }
 0x18d   : > { %v570_v21 = vadd.f32 %v840_v6, %v546_v11 }
 0x18e   : > { %v497_v36 = vpop.f32.mrf.mxu2 }
 0x18f   : > { %v547_v39 = vmax.f32 %v495_v25, %v497_v36  ;;  %v565_v25 = vadd.f32 %v840_v6, %v511_v15  ;;  %v578_v29 = vmax.f32 %v570_v21, 0.0  ;;  %v598_v36 = vrot.slane %v577_v27, 4 }
 0x191   : > { %v548_v43 = vrot.slane %v547_v39, 4  ;;  %v573_v33 = vmax.f32 %v565_v25, 0.0  ;;  %v601_v38 = vrot.slane %v578_v29, 3 }
 0x193   : > { %v549_v47 = vmax.f32 %v547_v39, %v548_v43  ;;  %v591_v37 = vsel %vm590_vm1, %v589_v28, %v573_v33 }
 0x194   : > { %v594_v40 = vsel %vm593_vm2, %v592_v31, %v591_v37 }
 0x195   : > { %v550_v52 = vrot.slane %v549_v47, 2  ;;  %v597_v43 = vsel %vm596_vm3, %v595_v34, %v594_v40 }
 0x196   : > { %v500_v53 = vpop.f32.mrf.mxu2  ;;  %v600_v44 = vsel %vm599_vm4, %v598_v36, %v597_v43 }
 0x197   : > { %v551_v60 = vmax.f32 %v549_v47, %v550_v52  ;;  %v603_v45 = vsel %vm602_vm5, %v601_v38, %v600_v44 }
 0x199   : > { %v552_v3 = vrot.slane %v551_v60, 1 }
 0x19b   : > { %v553_v14 = vmax.f32 %v551_v60, %v552_v3 }
 0x19d   : > { %v571_v24 = vadd.f32 %v840_v6, %v553_v14 }
 0x19e   : > { %v502_v4 = vpop.f32.mrf.mxu2 }
 0x19f   : > { %v554_v8 = vmax.f32 %v500_v53, %v502_v4  ;;  %v579_v32 = vmax.f32 %v571_v24, 0.0 }
 0x1a1   : > { %v555_v12 = vrot.slane %v554_v8, 4  ;;  %v604_v41 = vrot.slane %v579_v32, 2 }
 0x1a3   : > { %v556_v17 = vmax.f32 %v554_v8, %v555_v12  ;;  %v606_v47 = vsel %vm605_vm6, %v604_v41, %v603_v45 }
 0x1a5   : > { %v557_v22 = vrot.slane %v556_v17, 2 }
 0x1a7   : > { %v558_v26 = vmax.f32 %v556_v17, %v557_v22 }
 0x1a9   : > { %v559_v30 = vrot.slane %v558_v26, 1 }
 0x1ab   : > { %v560_v35 = vmax.f32 %v558_v26, %v559_v30 }
 0x1ad   : > { %v572_v39 = vadd.f32 %v840_v6, %v560_v35 }
 0x1af   : > { %v580_v42 = vmax.f32 %v572_v39, 0.0 }
 0x1b1   : > { %v607_v46 = vrot.slane %v580_v42, 1 }
 0x1b3   : > { %v609_v48 = vsel %vm608_vm7, %v607_v46, %v606_v47 }
 0x1b4   : > { %611 = vst [vmem:[%s218_s22] sm:$0xff] %v609_v48 }
 0x1b5   : > { %868 = shalt.err (!%p865_p3)
}
 0x1b6   : > { %800 = dma.vmem_to_hbm [thread:$0]  (%p973_p5), %s626_s6, 128, %s628_s7, %s613_s8  }
 0x1b7 PF: > { %p806_p4 = scmp.ge.s32.totalorder %s903_s21, 2  ;;  %s639_s16 = sand.u32 1, %s891_s18  }
 0x1b8   : > { %s640_s17 = scalar_lea.sflag [#allocation3], %s639_s16 }
 0x1b9   : > { %p803_p7 = pnand %p806_p4, %p977_p6 }
 0x1bb   : > { %p804_p8 = pneg %p803_p7 }
 0x1bd   : > { %886 = dma.done.wait (%p804_p8), %s640_s17, 128  }
 0x1be   : > { %888 = vsyncadd (%p804_p8), %s640_s17, 4294967168  ;;  %p15_p9 = scmp.ge.s32.totalorder %s960_s24, 4   ;;  %s1075_s18 = smov %s895_s19 }
 0x1bf   : > { %s1076_s19 = smov %s899_s20  ;;  %s1077_s20 = smov %s971_s27 }
 0x1c0   : > { %s1078_s21 = smov %s960_s24  ;;  %17 = sbr.rel (!%p15_p9) target bundleno = 3 (0x3), region = 75 }
 0x1c5   :  { %646 = vsyncpa [#allocation3], 1 }
 0x1c6   :  { %648 = vsyncpa [#allocation3 + $0x1], 1 }

</bundles_post_ra>
